<compile_context>
chip_gen: v5e
topology: v5e:2x2
jax: 0.10.0
libtpu: 0.0.40
codegen_flags: <defaults>
</compile_context>

<pallas_src>
import math

import jax
import jax.numpy as jnp
from jax import lax
from jax.experimental import pallas as pl
from jax.experimental.pallas import tpu as pltpu


# ---------------------------------------------------------------------------
# Single-context kernel (matches the PyTorch module's forward): VPU/XLU path.
# ---------------------------------------------------------------------------
def _context_pos_emb_kernel(x_ref, w_ref, b_ref, o_ref):
    # x_ref: (SoW_len, 1) f32 column, w_ref: (SoW_len, emb_dim) f32,
    # b_ref / o_ref: (1, emb_dim) f32.
    x = jnp.log10(x_ref[...])                    # EUP log, (S, 1)
    prod = x * w_ref[...]                        # VPU: lane-broadcast multiply, (S, E)
    # XLU sublane reduce over the contraction axis; bias folded into the store.
    o_ref[...] = jnp.sum(prod, axis=0, keepdims=True) + b_ref[...]


def context_position_embedding(context, weight_t, bias2d):
    """context: [SoW_len] (strictly positive), weight_t: [SoW_len, emb_dim] f32
    (pre-transposed at init), bias2d: [1, emb_dim] f32.

    Returns [1, 1, 1, emb_dim] f32, matching the PyTorch module's output.
    NOTE: log10 of non-positive values yields NaN/-inf (same as the PyTorch
    module); no guard is applied.
    """
    sow_len = context.shape[0]
    emb_dim = weight_t.shape[1]

    # Column layout so the contraction axis lands on sublanes; no transpose of
    # the weight and no dtype casts happen per call.
    x_col = jnp.asarray(context, jnp.float32).reshape(sow_len, 1)

    bytes_accessed = 4 * (sow_len + sow_len * emb_dim + emb_dim + emb_dim)
    out = pl.pallas_call(
        _context_pos_emb_kernel,
        out_shape=jax.ShapeDtypeStruct((1, emb_dim), jnp.float32),
        in_specs=[
            pl.BlockSpec(memory_space=pltpu.MemorySpace.VMEM),
            pl.BlockSpec(memory_space=pltpu.MemorySpace.VMEM),
            pl.BlockSpec(memory_space=pltpu.MemorySpace.VMEM),
        ],
        out_specs=pl.BlockSpec(memory_space=pltpu.MemorySpace.VMEM),
        cost_estimate=pl.CostEstimate(
            flops=2 * sow_len * emb_dim,
            transcendentals=sow_len,
            bytes_accessed=bytes_accessed,
        ),
    )(x_col, weight_t, bias2d)

    # unsqueeze(0).unsqueeze(0) on the [1, emb_dim] linear output (free reshape).
    return out.reshape(1, 1, 1, emb_dim)


# ---------------------------------------------------------------------------
# Batched variant: contexts [B, SoW_len] -> [B, emb_dim].
#   - default: ONE fat grid step (op is overhead-bound, working set << VMEM)
#   - B >= 512: two steps so v7x megacore ("parallel") shards across both TCs
# ---------------------------------------------------------------------------
_VMEM_BUDGET_BYTES = 16 << 20   # conservative vs v7x's 32 MiB scoped default


def _choose_block_b(B, sow_len, emb_dim):
    def step_bytes(bb):
        # double-buffered input/output blocks + full weight + bias, f32.
        return 4 * (2 * bb * sow_len + 2 * bb * emb_dim
                    + sow_len * emb_dim + emb_dim)

    bb = B
    # Split for megacore only when both halves are sublane-aligned (mult of 8).
    if B >= 512 and B % 2 == 0 and (B // 2) % 8 == 0:
        bb = B // 2
    # Guard the per-step working set for very large emb_dim * block_b.
    while step_bytes(bb) > _VMEM_BUDGET_BYTES and bb % 2 == 0 and (bb // 2) % 8 == 0 and B % (bb // 2) == 0:
        bb //= 2
    return bb


def _context_pos_emb_batched_kernel(x_ref, w_ref, b_ref, o_ref):
    x = jnp.log10(x_ref[...])                                    # (tb, S)
    # K = SoW_len is tiny, so the MXU is never the binding unit; use HIGHEST
    # precision to keep f32 parity with the reference at zero effective cost.
    y = jnp.dot(x, w_ref[...],
                precision=lax.Precision.HIGHEST,
                preferred_element_type=jnp.float32)
    o_ref[...] = y + b_ref[...]


def context_position_embedding_batched(contexts, weight_t, bias2d, *, block_b=None):
    """contexts: [B, SoW_len] f32 (strictly positive).  Returns [B, emb_dim] f32."""
    B, sow_len = contexts.shape
    emb_dim = weight_t.shape[1]
    if block_b is None:
        block_b = _choose_block_b(B, sow_len, emb_dim)
    # TODO(synk): ragged B (B % block_b != 0) would need a masked tail tile.
    assert B % block_b == 0, (B, block_b)

    bytes_accessed = 4 * (B * sow_len + sow_len * emb_dim + emb_dim + B * emb_dim)
    return pl.pallas_call(
        _context_pos_emb_batched_kernel,
        out_shape=jax.ShapeDtypeStruct((B, emb_dim), jnp.float32),
        grid=(B // block_b,),
        in_specs=[
            pl.BlockSpec((block_b, sow_len), lambda i: (i, 0)),
            pl.BlockSpec((sow_len, emb_dim), lambda i: (0, 0)),
            pl.BlockSpec((1, emb_dim), lambda i: (0, 0)),
        ],
        out_specs=pl.BlockSpec((block_b, emb_dim), lambda i: (i, 0)),
        compiler_params=pltpu.CompilerParams(
            dimension_semantics=("parallel",)),
        cost_estimate=pl.CostEstimate(
            flops=2 * B * sow_len * emb_dim,
            transcendentals=B * sow_len,
            bytes_accessed=bytes_accessed,
        ),
    )(contexts, weight_t, bias2d)


# ---------------------------------------------------------------------------
# Parameter init: nn.Linear default (uniform +-1/sqrt(fan_in)), returned in the
# kernel's layout so no transpose / cast is needed per forward call.
# (Optional v6e/v7x micro-opt: store weight_t in bf16 for the MXU path once
#  emb_dim is large; kept f32 here for a single v5e-safe codepath.)
# ---------------------------------------------------------------------------
def init_params(key, sow_len, emb_dim):
    kw, kb = jax.random.split(key)
    bound = 1.0 / math.sqrt(sow_len)
    weight = jax.random.uniform(kw, (emb_dim, sow_len), jnp.float32,
                                minval=-bound, maxval=bound)
    bias = jax.random.uniform(kb, (emb_dim,), jnp.float32,
                              minval=-bound, maxval=bound)
    # Hoisted once at init (not per call): pre-transpose + keep f32.
    weight_t = jnp.transpose(weight)            # (SoW_len, emb_dim)
    bias2d = bias.reshape(1, emb_dim)           # (1, emb_dim)
    return weight_t, bias2d


if __name__ == "__main__":
    SoW_len = 8
    embedding_dim = 128   # lane-dense output (multiple of 128)

    key = jax.random.PRNGKey(0)
    k_ctx, k_params, k_batch = jax.random.split(key, 3)

    weight_t, bias2d = init_params(k_params, SoW_len, embedding_dim)

    # --- module-semantics path (single context vector, B = 1) ----------------
    # context must be strictly positive (log10 in the forward pass)
    context = jax.random.uniform(k_ctx, (SoW_len,), jnp.float32,
                                 minval=0.1, maxval=10.0)
    out = jax.block_until_ready(
        context_position_embedding(context, weight_t, bias2d))

    # Exact f32 elementwise reference (same math as the VPU kernel path).
    log_ctx = jnp.log10(context)
    ref = (jnp.sum(log_ctx[:, None] * weight_t, axis=0, keepdims=True)
           + bias2d).reshape(1, 1, 1, embedding_dim)
    assert out.shape == (1, 1, 1, embedding_dim), out.shape
    assert jnp.allclose(out, ref, atol=1e-5, rtol=1e-5), "B=1 mismatch vs reference"

    # --- batched path (single fat grid step at this size) --------------------
    B = 16
    contexts = jax.random.uniform(k_batch, (B, SoW_len), jnp.float32,
                                  minval=0.1, maxval=10.0)
    out_b = jax.block_until_ready(
        context_position_embedding_batched(contexts, weight_t, bias2d))
    ref_b = jnp.einsum("bs,se->be", jnp.log10(contexts), weight_t,
                       precision=lax.Precision.HIGHEST) + bias2d
    assert out_b.shape == (B, embedding_dim), out_b.shape
    assert jnp.allclose(out_b, ref_b, atol=1e-5, rtol=1e-5), "batched mismatch vs reference"

    print("KERNEL_OK")
</pallas_src>

<mosaic_0001>
module attributes {stable_mosaic.version = 11 : i64} {
  func.func @_context_pos_emb_kernel(%arg0: memref<8x1xf32, #tpu.memory_space<vmem>>, %arg1: memref<8x128xf32, #tpu.memory_space<vmem>>, %arg2: memref<1x128xf32, #tpu.memory_space<vmem>>, %arg3: memref<1x128xf32, #tpu.memory_space<vmem>>) attributes {dimension_semantics = [], scalar_prefetch = 0 : i64, scratch_operands = 0 : i64, tpu.core_type = #tpu.core_type<tc>} {
    %c0 = arith.constant 0 : index
    %c0_0 = arith.constant 0 : index
    %0 = vector.load %arg0[%c0, %c0_0] : memref<8x1xf32, #tpu.memory_space<vmem>>, vector<8x1xf32>
    %1 = math.log %0 : vector<8x1xf32>
    %cst = arith.constant 0.434294492 : f32
    %2 = vector.broadcast %cst : f32 to vector<8x1xf32>
    %3 = arith.mulf %1, %2 : vector<8x1xf32>
    %c0_1 = arith.constant 0 : index
    %c0_2 = arith.constant 0 : index
    %4 = vector.load %arg1[%c0_1, %c0_2] : memref<8x128xf32, #tpu.memory_space<vmem>>, vector<8x128xf32>
    %5 = vector.broadcast %3 : vector<8x1xf32> to vector<8x128xf32>
    %6 = arith.mulf %5, %4 : vector<8x128xf32>
    %cst_3 = arith.constant dense<0.000000e+00> : vector<128xf32>
    %7 = vector.multi_reduction <add>, %6, %cst_3 [0] : vector<8x128xf32> to vector<128xf32>
    %8 = vector.shape_cast %7 : vector<128xf32> to vector<1x128xf32>
    %c0_4 = arith.constant 0 : index
    %c0_5 = arith.constant 0 : index
    %9 = vector.load %arg2[%c0_4, %c0_5] : memref<1x128xf32, #tpu.memory_space<vmem>>, vector<1x128xf32>
    %10 = arith.addf %8, %9 : vector<1x128xf32>
    %c0_6 = arith.constant 0 : index
    %c0_7 = arith.constant 0 : index
    %11 = vector.load %arg3[%c0_6, %c0_7] : memref<1x128xf32, #tpu.memory_space<vmem>>, vector<1x128xf32>
    tpu.vector_store %arg3[%c0_6, %c0_7], %10 {strides = array<i32>} : memref<1x128xf32, #tpu.memory_space<vmem>>, vector<1x128xf32>,
    return
  }
}

</mosaic_0001>

<bundles_post_ra>
// kernel: tpu_custom_call.1
= control target key start
LH: loop header
LB: loop body
LE: loop exit
PB: predicated region body
PF: predicated region fallthrough
CT: control target
= control target key end

     0   :  { %s116_s0 = inlined_call_operand.vmem [shape: f32[8,1], index: 0, kind: input, shape index: {}]   ;;  %s117_s1 = inlined_call_operand.vmem [shape: f32[8,128], index: 1, kind: input, shape index: {}]   ;;  %s118_s2 = inlined_call_operand.vmem [shape: f32[1,128], index: 2, kind: input, shape index: {}]   ;;  %s119_s3 = inlined_call_operand.hbm [shape: f32[1,128], index: 3, kind: output, shape index: {}]  }
   0x1   :  { %v15_v0 = vld [vmem:[%s116_s0] sm:$0xff] }
   0x2   :  { %8 = vsyncpa [#allocation3], 0  ;;  %v82_v1 = vmov 0   ;;  %54 = vlog2.f32 %v15_v0  ;;  %v19_v5 = vld [vmem:[%s117_s1] sm:$0xff]  ;;  %s83_s17 = smov [#allocation2]   ;;  %s42_s21 = sshll.u32 %s119_s3, 4  ;;  %s43_s21 = int_to_ptr.hbm [resolvable:$true] %s42_s21 }
   0x3   :  { %53 = vset.pattern.permute.xlu0 %v82_v1  ;;  %v32_v13 = vld [vmem:[%s118_s2] sm:$0x1]  ;;  %s40_s18 = sshll.u32 %s83_s17, 4  ;;  %s41_s18 = int_to_ptr.vmem [resolvable:$true] %s40_s18 }
   0x8   :  { %v55_v2 = vpop.eup %54 }
   0x9   :  { %v17_v3 = vmul.f32 0.6931472, %v55_v2 }
   0xb   :  { %v18_v4 = vmul.f32 0.4342945, %v17_v3 }
   0xd   :  { %22 = vperm.xlu0 %53, %v18_v4  }
  0x7f   :  { %v23_v6 = vpop.permute.xlu0 %22 }
  0x80   :  { %v25_v7 = vmul.f32 %v23_v6, %v19_v5 }
  0x82   :  { %v26_v8 = vrot.slane %v25_v7, 4 }
  0x84   :  { %v27_v9 = vadd.f32 %v26_v8, %v25_v7 }
  0x86   :  { %v28_v10 = vrot.slane %v27_v9, 2 }
  0x88   :  { %v29_v11 = vadd.f32 %v28_v10, %v27_v9 }
  0x8a   :  { %v30_v12 = vrot.slane %v29_v11, 1 }
  0x8c   :  { %v31_v14 = vadd.f32 %v30_v12, %v29_v11 }
  0x8e   :  { %v33_v15 = vadd.f32 %v32_v13, %v31_v14 }
  0x90   :  { %34 = vst [vmem:[#allocation2] sm:$0x1] %v33_v15 }
  0x91   :  { %45 = dma.vmem_to_hbm [thread:$0]  %s41_s18, 16, %s43_s21, [#allocation3]  }
  0x92   :  { %80 = dma.done.wait [#allocation3], 16  }
  0x93   :  { %81 = vsyncadd [#allocation3], 4294967280 }
  0x94   :  { %50 = vsyncpa [#allocation3], 1 }

</bundles_post_ra>
